<compile_context>
chip_gen: v7x
topology: tpu7x:2x2x1
jax: 0.10.0
libtpu: 0.0.40
codegen_flags: <defaults>
</compile_context>

<pallas_src>
import jax
import jax.numpy as jnp
from jax.experimental import pallas as pl
from jax.experimental.pallas import tpu as pltpu


def _round_up(v, mul):
    return -(-v // mul) * mul


def _make_mse_kernel(tile_rows, valid_last_rows, ragged):
    """Per-tile squared-difference accumulation.

    out_ref is an (8, 128) f32 block resident across the single 'arbitrary'
    grid axis: a vreg-shaped partial sum reduced to a scalar in the wrapper.
    """

    def kernel(x_ref, t_ref, out_ref):
        i = pl.program_id(0)

        @pl.when(i == 0)
        def _():
            out_ref[...] = jnp.zeros_like(out_ref)

        diff = x_ref[...].astype(jnp.float32) - t_ref[...].astype(jnp.float32)

        if ragged:
            # Only the final (partial) block has rows past the end of the
            # slab; zero them before the square-accumulate.  Branchless:
            # full blocks get valid == tile_rows (all-true mask), costing a
            # couple of VPU ops that are fully hidden under the HBM stream.
            row_ids = jax.lax.broadcasted_iota(jnp.int32, diff.shape, 0)
            valid = jnp.where(i == pl.num_programs(0) - 1,
                              valid_last_rows, tile_rows)
            diff = jnp.where(row_ids < valid, diff, 0.0)

        sq = diff * diff
        # Fold the (tile_rows, 128) tile onto the (8, 128) accumulator with
        # plain VPU adds — no cross-lane reduce and no scalar store per step.
        out_ref[...] += jnp.sum(sq.reshape(-1, 8, sq.shape[-1]), axis=0)

    return kernel


def content_loss(x, target, *, tile_rows=8192, lanes=128):
    """MSE loss between x and target (any matching shape), via Pallas."""
    assert x.shape == target.shape, "input/target shape mismatch"
    n_elems = x.size

    x_item = jnp.dtype(x.dtype).itemsize
    t_item = jnp.dtype(target.dtype).itemsize

    # ---- lane-dense 2-D view (free bitcast; no pad on the hot path) --------
    xf = jnp.ravel(x)
    tf = jnp.ravel(target)
    rem = n_elems % lanes
    if rem:
        # Rare path (n_elems not a multiple of 128): pad the flat view by
        # < 128 zeros so it reshapes to [m, 128]; zeros contribute 0.
        pad = lanes - rem
        xf = jnp.pad(xf, (0, pad))
        tf = jnp.pad(tf, (0, pad))
    m = xf.size // lanes
    x2 = xf.reshape(m, lanes)
    t2 = tf.reshape(m, lanes)

    # ---- choose tiling ------------------------------------------------------
    # Sub-32-bit dtypes pack 2+ rows per sublane: keep row counts 16-aligned.
    row_mult = 16 if min(x_item, t_item) < 4 else 8
    # Cap each input block at ~6 MiB so 2 inputs x 2 pipeline buffers stay
    # well inside even v7x's 64 MiB VMEM.
    max_block_bytes = 6 << 20
    vmem_cap_rows = max(
        row_mult,
        (max_block_bytes // (lanes * max(x_item, t_item))) // row_mult * row_mult,
    )
    tile_rows = _round_up(max(1, tile_rows), row_mult)
    tile_rows = max(row_mult,
                    min(tile_rows, vmem_cap_rows, _round_up(m, row_mult)))
    steps = -(-m // tile_rows)
    valid_last_rows = m - (steps - 1) * tile_rows
    ragged = valid_last_rows != tile_rows

    # ---- VMEM budget: 2 inputs x 2 pipeline buffers + accumulator ----------
    per_step_in_bytes = tile_rows * lanes * (x_item + t_item)
    needed = 2 * per_step_in_bytes + 2 * 8 * lanes * 4 + (6 << 20)
    try:
        vmem_cap = int(pltpu.get_tpu_info().vmem_capacity_bytes)
    except Exception:
        vmem_cap = 64 << 20  # conservative default: v7x per-TC VMEM
    vmem_limit = int(min(max(needed, 32 << 20), vmem_cap - (16 << 20)))
    vmem_limit = max(vmem_limit, needed)

    cost = pl.CostEstimate(
        flops=3 * n_elems,
        transcendentals=0,
        bytes_accessed=int(n_elems * (x_item + t_item) + 8 * lanes * 4),
    )

    partials = pl.pallas_call(
        _make_mse_kernel(tile_rows, valid_last_rows, ragged),
        out_shape=jax.ShapeDtypeStruct((8, lanes), jnp.float32),
        grid_spec=pltpu.PrefetchScalarGridSpec(
            num_scalar_prefetch=0,
            grid=(steps,),
            in_specs=[
                pl.BlockSpec((tile_rows, lanes), lambda i: (i, 0)),
                pl.BlockSpec((tile_rows, lanes), lambda i: (i, 0)),
            ],
            out_specs=pl.BlockSpec((8, lanes), lambda i: (0, 0)),
        ),
        compiler_params=pltpu.CompilerParams(
            dimension_semantics=("arbitrary",),
            vmem_limit_bytes=vmem_limit,
        ),
        cost_estimate=cost,
    )(x2, t2)

    # Final scalar reduce + divide by the TRUE element count (not padded).
    return jnp.sum(partials) / jnp.float32(n_elems)


if __name__ == "__main__":
    key = jax.random.PRNGKey(0)
    kx, kt = jax.random.split(key)

    # Shapes consistent with a conv feature map fed to ContentLoss: NCHW.
    B, C, H, W = 2, 4, 16, 16
    x = jax.random.normal(kx, (B, C, H, W), dtype=jnp.float32)
    # "target" is fixed/detached at module construction time in PyTorch;
    # here it is just a deterministic constant input.
    target = jax.random.normal(kt, (B, C, H, W), dtype=jnp.float32)

    loss = jax.block_until_ready(content_loss(x, target))
    ref = jnp.mean((x - target) ** 2)
    assert jnp.allclose(loss, ref, rtol=1e-5, atol=1e-6), (loss, ref)

    # Sanity: multi-step accumulation path (steps > 1, resident accumulator).
    loss_ms = jax.block_until_ready(content_loss(x, target, tile_rows=8))
    assert jnp.allclose(loss_ms, ref, rtol=1e-5, atol=1e-6), (loss_ms, ref)

    # Sanity: ragged path (n_elems not a multiple of 128 * tile_rows) —
    # exercises the in-kernel row mask that replaced the jnp.pad copy.
    xr = jax.random.normal(kx, (3, 5, 7, 11), dtype=jnp.float32)
    tr = jax.random.normal(kt, (3, 5, 7, 11), dtype=jnp.float32)
    loss_r = jax.block_until_ready(content_loss(xr, tr))
    ref_r = jnp.mean((xr - tr) ** 2)
    assert jnp.allclose(loss_r, ref_r, rtol=1e-5, atol=1e-6), (loss_r, ref_r)

    print("KERNEL_OK")
</pallas_src>

<mosaic_0001>
module attributes {stable_mosaic.version = 11 : i64} {
  func.func @kernel(%arg0: i32, %arg1: memref<16x128xf32, #tpu.memory_space<vmem>>, %arg2: memref<16x128xf32, #tpu.memory_space<vmem>>, %arg3: memref<8x128xf32, #tpu.memory_space<vmem>>) attributes {dimension_semantics = [#tpu.dimension_semantics<arbitrary>], iteration_bounds = array<i64: 1>, scalar_prefetch = 0 : i64, scratch_operands = 0 : i64, tpu.core_type = #tpu.core_type<tc>, window_params = [{transform_indices = @transform_0, window_bounds = array<i64: 16, 128>}, {transform_indices = @transform_1, window_bounds = array<i64: 16, 128>}, {pipeline_mode = #tpu.pipeline_mode<synchronous>, transform_indices = @transform_2, window_bounds = array<i64: 8, 128>}]} {
    %c0_i32 = arith.constant 0 : i32
    %0 = arith.cmpi eq, %arg0, %c0_i32 : i32
    %1 = arith.extui %0 : i1 to i32
    %c0_i32_0 = arith.constant 0 : i32
    %2 = arith.cmpi ne, %1, %c0_i32_0 : i32
    scf.if %2 {
      %cst_8 = arith.constant 0.000000e+00 : f32
      %12 = vector.broadcast %cst_8 : f32 to vector<8x128xf32>
      %c0_9 = arith.constant 0 : index
      %c0_10 = arith.constant 0 : index
      %13 = vector.load %arg3[%c0_9, %c0_10] : memref<8x128xf32, #tpu.memory_space<vmem>>, vector<8x128xf32>
      tpu.vector_store %arg3[%c0_9, %c0_10], %12 {strides = array<i32>} : memref<8x128xf32, #tpu.memory_space<vmem>>, vector<8x128xf32>,
    } else {
    }
    %c0 = arith.constant 0 : index
    %c0_1 = arith.constant 0 : index
    %3 = vector.load %arg1[%c0, %c0_1] : memref<16x128xf32, #tpu.memory_space<vmem>>, vector<16x128xf32>
    %c0_2 = arith.constant 0 : index
    %c0_3 = arith.constant 0 : index
    %4 = vector.load %arg2[%c0_2, %c0_3] : memref<16x128xf32, #tpu.memory_space<vmem>>, vector<16x128xf32>
    %5 = arith.subf %3, %4 : vector<16x128xf32>
    %6 = arith.mulf %5, %5 : vector<16x128xf32>
    %c0_4 = arith.constant 0 : index
    %c0_5 = arith.constant 0 : index
    %7 = vector.load %arg3[%c0_4, %c0_5] : memref<8x128xf32, #tpu.memory_space<vmem>>, vector<8x128xf32>
    %8 = vector.shape_cast %6 : vector<16x128xf32> to vector<2x8x128xf32>
    %cst = arith.constant dense<0.000000e+00> : vector<8x128xf32>
    %9 = vector.multi_reduction <add>, %8, %cst [0] : vector<2x8x128xf32> to vector<8x128xf32>
    %10 = arith.addf %7, %9 : vector<8x128xf32>
    %c0_6 = arith.constant 0 : index
    %c0_7 = arith.constant 0 : index
    %11 = vector.load %arg3[%c0_6, %c0_7] : memref<8x128xf32, #tpu.memory_space<vmem>>, vector<8x128xf32>
    tpu.vector_store %arg3[%c0_6, %c0_7], %10 {strides = array<i32>} : memref<8x128xf32, #tpu.memory_space<vmem>>, vector<8x128xf32>,
    return
  }
  func.func @transform_0(%arg0: i32) -> (i32, i32) {
    %c0_i32 = arith.constant 0 : i32
    %c0_i32_0 = arith.constant 0 : i32
    return %arg0, %c0_i32 : i32, i32
  }
  func.func @transform_1(%arg0: i32) -> (i32, i32) {
    %c0_i32 = arith.constant 0 : i32
    %c0_i32_0 = arith.constant 0 : i32
    return %arg0, %c0_i32 : i32, i32
  }
  func.func @transform_2(%arg0: i32) -> (i32, i32) {
    %c0_i32 = arith.constant 0 : i32
    %c0_i32_0 = arith.constant 0 : i32
    %c0_i32_1 = arith.constant 0 : i32
    return %c0_i32, %c0_i32_0 : i32, i32
  }
}

</mosaic_0001>

<bundles_post_ra>
// kernel: tpu_custom_call.1
= control target key start
LH: loop header
LB: loop body
LE: loop exit
PB: predicated region body
PF: predicated region fallthrough
CT: control target
= control target key end

     0   :  { %7 = vsyncpa [#allocation3], 0  ;;  %s207_s0 = inlined_call_operand.hbm [shape: f32[16,128], index: 0, kind: input, shape index: {}]   ;;  %s208_s1 = inlined_call_operand.hbm [shape: f32[16,128], index: 1, kind: input, shape index: {}]   ;;  %s209_s2 = inlined_call_operand.hbm [shape: f32[8,128], index: 2, kind: output, shape index: {}]  }
   0x1   :  { %8 = vsyncpa [#allocation6], 0 }
   0x2   :  { %9 = vsyncpa [#allocation4], 0  ;;  %s151_s9 = smov [#allocation2]   ;;  %s79_s13 = scalar_lea.hbm %s207_s0, 256 }
   0x3   :  { %s15_s10 = sshll.u32 %s151_s9, 4  ;;  %p80_p0 = scmp.ne.s32.totalorder %s207_s0, %s79_s13  ;;  %s16_s10 = int_to_ptr.vmem [resolvable:$true] %s15_s10 }
   0x4   :  { %p83_p1 = scmp.lt.u32.totalorder %s79_s13, %s207_s0 }
   0x6   :  { %p85_p2 = pnand %p83_p1, %p80_p0 }
   0x8   :  { %88 = shalt.err (!%p85_p2)
}
   0x9   :  { %s89_s18 = scalar_lea.vmem %s16_s10, 256  ;;  %p94_p4 = scmp.lt.s32.totalorder %s16_s10, %s16_s10 }
   0xa   :  { %p90_p3 = scmp.ne.s32.totalorder %s16_s10, %s89_s18  ;;  %p95_p5 = scmp.lt.s32.totalorder %s89_s18, %s89_s18 }
   0xc   :  { %p96_p6 = por %p95_p5, %p94_p4 }
   0xe   :  { %p97_p7 = pnand %p96_p6, %p90_p3 }
  0x10   :  { %100 = shalt.err (!%p97_p7)
}
  0x11   :  { %s152_s19 = smov 128   ;;  %s153_s20 = smov 8  }
  0x12   :  { %21 = dma.hbm_to_vmem [thread:$0]  %s207_s0, 256, %s16_s10, [#allocation3], %s152_s19, %s152_s19, %s153_s20  }
  0x13   :  { %s154_s23 = smov [#allocation5]   ;;  %s101_s27 = scalar_lea.hbm %s208_s1, 256 }
  0x14   :  { %s27_s24 = sshll.u32 %s154_s23, 4  ;;  %p102_p8 = scmp.ne.s32.totalorder %s208_s1, %s101_s27  ;;  %s28_s24 = int_to_ptr.vmem [resolvable:$true] %s27_s24 }
  0x15   :  { %p105_p9 = scmp.lt.u32.totalorder %s101_s27, %s208_s1 }
  0x17   :  { %p107_p10 = pnand %p105_p9, %p102_p8 }
  0x19   :  { %110 = shalt.err (!%p107_p10)
}
  0x1a   :  { %s111_s4 = scalar_lea.vmem %s28_s24, 256  ;;  %p116_p12 = scmp.lt.s32.totalorder %s28_s24, %s28_s24 }
  0x1b   :  { %p112_p11 = scmp.ne.s32.totalorder %s28_s24, %s111_s4  ;;  %p117_p13 = scmp.lt.s32.totalorder %s111_s4, %s111_s4 }
  0x1d   :  { %p118_p0 = por %p117_p13, %p116_p12 }
  0x1f   :  { %p119_p1 = pnand %p118_p0, %p112_p11 }
  0x21   :  { %122 = shalt.err (!%p119_p1)
}
  0x22   :  { %33 = dma.hbm_to_vmem [thread:$0]  %s208_s1, 256, %s28_s24, [#allocation6], %s152_s19, %s152_s19, %s153_s20  }
  0x23   :  { %145 = dma.done.wait [#allocation3], 256  }
  0x24   :  { %146 = vsyncadd [#allocation3], 4294967040 }
  0x25   :  { %147 = dma.done.wait [#allocation6], 256  }
  0x26   :  { %148 = vsyncadd [#allocation6], 4294967040  ;;  %v45_v0 = vld [vmem:[#allocation2] sm:$0xff]  ;;  %v46_v1 = vld [vmem:[#allocation2 + $0x8] sm:$0xff]  ;;  %s155_s6 = smov [#allocation7]  }
  0x27   :  { %v47_v2 = vld [vmem:[#allocation5] sm:$0xff]  ;;  %v48_v3 = vld [vmem:[#allocation5 + $0x8] sm:$0xff]  ;;  %s63_s7 = sshll.u32 %s155_s6, 4  ;;  %s64_s7 = int_to_ptr.vmem [resolvable:$true] %s63_s7 }
  0x28   :  { %v49_v4 = vsub.f32 %v45_v0, %v47_v2  ;;  %v50_v5 = vsub.f32 %v46_v1, %v48_v3  ;;  %s123_s8 = scalar_lea.vmem %s64_s7, 128  ;;  %p128_p3 = scmp.lt.s32.totalorder %s64_s7, %s64_s7 }
  0x29   :  { %p124_p2 = scmp.ne.s32.totalorder %s64_s7, %s123_s8  ;;  %p129_p4 = scmp.lt.s32.totalorder %s123_s8, %s123_s8 }
  0x2a   :  { %v51_v6 = vmul.f32 %v49_v4, %v49_v4  ;;  %v52_v7 = vmul.f32 %v50_v5, %v50_v5 }
  0x2b   :  { %p130_p5 = por %p129_p4, %p128_p3 }
  0x2c   :  { %v54_v8 = vadd.f32 %v52_v7, %v51_v6 }
  0x2d   :  { %p131_p6 = pnand %p130_p5, %p124_p2 }
  0x2e   :  { %56 = vst [vmem:[#allocation7] sm:$0xff] %v54_v8 }
  0x2f   :  { %134 = shalt.err (!%p131_p6)
}
  0x30   :  { %s135_s10 = scalar_lea.hbm %s209_s2, 128 }
  0x31   :  { %p136_p7 = scmp.ne.s32.totalorder %s209_s2, %s135_s10  ;;  %p139_p8 = scmp.lt.u32.totalorder %s135_s10, %s209_s2 }
  0x33   :  { %p141_p9 = pnand %p139_p8, %p136_p7 }
  0x35   :  { %144 = shalt.err (!%p141_p9)
}
  0x36   :  { %66 = dma.vmem_to_hbm [thread:$0]  %s64_s7, 128, %s209_s2, [#allocation4]  }
  0x37   :  { %149 = dma.done.wait [#allocation4], 128  }
  0x38   :  { %150 = vsyncadd [#allocation4], 4294967168 }
  0x39   :  { %70 = vsyncpa [#allocation3], 1 }
  0x3a   :  { %71 = vsyncpa [#allocation6], 1 }
  0x3b   :  { %72 = vsyncpa [#allocation4], 1 }

</bundles_post_ra>
